<compile_context>
chip_gen: v5e
topology: v5e:2x2
jax: 0.10.0
libtpu: 0.0.40
codegen_flags: <defaults>
</compile_context>

<pallas_src>
import functools
import math

import jax
import jax.numpy as jnp
import numpy as np
from jax import lax
from jax.experimental import pallas as pl
from jax.experimental.pallas import tpu as pltpu

EPS = 1e-12


def _round_up(x, m):
    return ((x + m - 1) // m) * m


@functools.lru_cache(maxsize=None)
def _dft_matrices_np(seq_len: int):
    """Stacked real-DFT matrices for rfft/irfft along seq with norm='ortho'.

    F2  (2*Fp, S): xri = F2 @ x   -> xri[:Fp] = Re(rfft x), xri[Fp:] = Im(rfft x)
    CRI (2, S, Fp): x = CRI[0] @ xr + CRI[1] @ xi  (exact Hermitian reconstruction)
    F = S//2+1 is zero-padded to Fp = ceil8(F); padded rows/cols are zero.
    """
    n = seq_len
    f = n // 2 + 1
    fp = _round_up(f, 8)
    t = np.arange(n, dtype=np.float64)
    k = np.arange(f, dtype=np.float64)
    ang = 2.0 * math.pi * np.outer(k, t) / n              # (F, S)
    scale = 1.0 / math.sqrt(n)

    fc = np.zeros((fp, n), np.float64)
    fc[:f] = np.cos(ang) * scale
    fs = np.zeros((fp, n), np.float64)
    fs[:f] = -np.sin(ang) * scale
    f2 = np.concatenate([fc, fs], axis=0)                 # (2Fp, S)

    a = np.full((f,), 2.0)
    a[0] = 1.0
    if n % 2 == 0:
        a[-1] = 1.0                                       # Nyquist counted once
    cr = np.zeros((n, fp), np.float64)
    cr[:, :f] = (a[:, None] * np.cos(ang)).T * scale
    ci = np.zeros((n, fp), np.float64)
    ci[:, :f] = (-(a[:, None]) * np.sin(ang)).T * scale
    cri = np.stack([cr, ci], axis=0)                      # (2, S, Fp)

    return f2.astype(np.float32), cri.astype(np.float32), fp


def _vmem_limit_bytes():
    """Generation-aware scoped-VMEM limit (~100 MiB on v5e/v6e, ~48 MiB on v7x)."""
    cap = None
    try:
        info = pltpu.get_tpu_info()
        cap = getattr(info, "vmem_capacity_bytes", None)
    except Exception:
        cap = None
    if not cap:
        cap = 64 << 20                                    # most conservative (v7x per-TC)
    cap = int(cap)
    return max(32 << 20, min(cap - (16 << 20), 100 << 20))


def _pick_tb(batch, seq_len, hidden, fp, budget_bytes, max_tbd=2048):
    """Batch rows per block.  TB*hidden is a multiple of 128 (lane-dense slabs); TB is
    sized against the VMEM budget (blocks + single-buffered invariants) and capped so
    the grid keeps >= 2 (preferably >= 4) steps for megacore sharding / pipelining."""
    align = 128 // math.gcd(hidden, 128)                  # smallest TB with TBD % 128 == 0

    def vmem_bytes(tb):
        tbd = tb * hidden
        blocks = 2 * 2 * seq_len * tbd * 4                # x in + out, double-buffered
        inv = 4 * (2 * fp * seq_len + 2 * seq_len * fp    # F2, [Cr;Ci]   (Buffered(1))
                   + 2 * fp * tbd + 2 * tbd               # tiled filter, gamma/beta
                   + 2 * tb * tbd)                        # group mean / broadcast mats
        return blocks + inv

    cap = align
    if batch > align:
        target_steps = 4 if batch >= 4 * align else 2
        cap = _round_up(-(-batch // target_steps), align)
    tbd_cap = max(align, (max_tbd // hidden) // align * align)
    cap = max(align, min(cap, tbd_cap))

    tb = align
    t = align
    while t <= cap and vmem_bytes(t) <= budget_bytes:
        tb = t
        t += align
    return tb


# ---------------------------------------------------------------------------
# Fused kernel: one lane-batched (S, TB*D) slab per grid step.
#   y = irfft(rfft(x) * W) ; out = LayerNorm(y + x)
# ---------------------------------------------------------------------------
def _filter_kernel(x_ref, f2_ref, cri_ref, w_ref, ln_ref, gm_ref, bm_ref, o_ref,
                   *, fp: int, mm_dtype):
    x = x_ref[...]                                                   # (S, TBD) f32

    # rfft (real/imag stacked) of all TB rows in ONE lane-batched MXU matmul.
    xri = jnp.dot(f2_ref[...], x.astype(mm_dtype),
                  preferred_element_type=jnp.float32)                # (2Fp, TBD)
    xr = xri[:fp]                                                    # sublane-aligned slices
    xi = xri[fp:]

    # learnable complex filter (weights pre-tiled across the TB lane groups)
    wr = w_ref[0]                                                    # (Fp, TBD)
    wi = w_ref[1]
    yr = xr * wr - xi * wi
    yi = xr * wi + xi * wr

    # irfft: Hermitian reconstruction split into two dots (no concatenate copy).
    y = (jnp.dot(cri_ref[0], yr.astype(mm_dtype), preferred_element_type=jnp.float32)
         + jnp.dot(cri_ref[1], yi.astype(mm_dtype), preferred_element_type=jnp.float32))

    # dropout = identity at inference; residual + TF-style LayerNorm per D-group.
    h = y + x                                                        # (S, TBD) f32
    gm = gm_ref[...]                                                 # (TBD, TB) 1/D on group
    bm = bm_ref[...]                                                 # (TB, TBD) group bcast
    u = jnp.dot(jnp.dot(h, gm, preferred_element_type=jnp.float32), bm,
                preferred_element_type=jnp.float32)                  # per-group mean, bcast
    d = h - u
    v = jnp.dot(jnp.dot(d * d, gm, preferred_element_type=jnp.float32), bm,
                preferred_element_type=jnp.float32)                  # per-group var, bcast
    ln = ln_ref[...]                                                 # (2, TBD)
    o_ref[...] = ln[0:1] * (d * lax.rsqrt(v + EPS)) + ln[1:2]        # lane-dense store


# ---------------------------------------------------------------------------
# Wrapper
# ---------------------------------------------------------------------------
def _filter_layer_impl(x, complex_weight, ln_gamma, ln_beta, use_bf16_matmul):
    B, S, D = x.shape
    F = S // 2 + 1
    x = x.astype(jnp.float32)

    f2_np, cri_np, Fp = _dft_matrices_np(S)
    vmem_limit = _vmem_limit_bytes()
    TB = _pick_tb(B, S, D, Fp, budget_bytes=int(vmem_limit * 0.7))
    TBD = TB * D
    Bp = _round_up(max(B, TB), TB)
    steps = Bp // TB

    mm_dtype = jnp.bfloat16 if use_bf16_matmul else jnp.float32
    f2 = jnp.asarray(f2_np, dtype=mm_dtype)                          # baked constants under jit
    cri = jnp.asarray(cri_np, dtype=mm_dtype)

    # Lane-batched input slab: (S, Bp*D); batch row b occupies lanes [b*D, (b+1)*D).
    xs = x
    if Bp != B:
        xs = jnp.pad(xs, ((0, Bp - B), (0, 0), (0, 0)))
    xs = jnp.transpose(xs, (1, 0, 2)).reshape(S, Bp * D)

    # Filter weight and gamma/beta tiled over the TB lane groups (grid-invariant).
    pad = Fp - F
    wr = jnp.pad(complex_weight[0, :, :, 0], ((0, pad), (0, 0)))     # (Fp, D)
    wi = jnp.pad(complex_weight[0, :, :, 1], ((0, pad), (0, 0)))
    w2 = jnp.stack([jnp.tile(wr, (1, TB)), jnp.tile(wi, (1, TB))], axis=0)   # (2, Fp, TBD)
    ln = jnp.stack([jnp.tile(ln_gamma.astype(jnp.float32), TB),
                    jnp.tile(ln_beta.astype(jnp.float32), TB)], axis=0)      # (2, TBD)

    # Block-diagonal per-D-group mean / broadcast matrices for the LN epilogue.
    gid = np.arange(TBD) // D
    gm = jnp.asarray((gid[:, None] == np.arange(TB)[None, :]).astype(np.float32) / D)  # (TBD, TB)
    bm = jnp.asarray((np.arange(TB)[:, None] == gid[None, :]).astype(np.float32))      # (TB, TBD)

    flops_step = (
        2 * (2 * Fp) * S * TBD            # forward stacked DFT matmul
        + 2 * (2 * S * Fp * TBD)          # two inverse-DFT matmuls
        + 6 * Fp * TBD                    # complex filter multiply
        + 2 * (4 * S * TB * TBD)          # group mean / variance matmuls
        + 10 * S * TBD                    # residual + LN elementwise
    )
    cost = pl.CostEstimate(
        flops=int(steps * flops_step),
        transcendentals=int(steps * S * TBD),
        bytes_accessed=int(4 * (2 * S * Bp * D + 2 * Fp * S + 2 * S * Fp
                                + 2 * Fp * TBD + 2 * TBD + 2 * TB * TBD)),
    )

    kernel = functools.partial(_filter_kernel, fp=Fp, mm_dtype=mm_dtype)
    inv = functools.partial(pl.BlockSpec, pipeline_mode=pl.Buffered(1))   # single-buffer invariants

    out2d = pl.pallas_call(
        kernel,
        out_shape=jax.ShapeDtypeStruct((S, Bp * D), jnp.float32),
        grid=(steps,),
        in_specs=[
            pl.BlockSpec((S, TBD), lambda i: (0, i)),                 # x slab (lane blocks)
            inv((2 * Fp, S), lambda i: (0, 0)),                       # F2  (grid-invariant)
            inv((2, S, Fp), lambda i: (0, 0, 0)),                     # [Cr ; Ci]
            inv((2, Fp, TBD), lambda i: (0, 0, 0)),                   # tiled complex weight
            inv((2, TBD), lambda i: (0, 0)),                          # [gamma ; beta]
            inv((TBD, TB), lambda i: (0, 0)),                         # group-mean matrix
            inv((TB, TBD), lambda i: (0, 0)),                         # group-broadcast matrix
        ],
        out_specs=pl.BlockSpec((S, TBD), lambda i: (0, i)),           # lane-dense output
        compiler_params=pltpu.CompilerParams(
            dimension_semantics=("parallel",),                        # batch axis -> 2 TCs on v7x
            vmem_limit_bytes=vmem_limit,
        ),
        cost_estimate=cost,
    )(xs, f2, cri, w2, ln, gm, bm)

    out = jnp.transpose(out2d.reshape(S, Bp, D), (1, 0, 2))           # undo lane batching
    return out[:B]


@functools.partial(jax.jit, static_argnames=("use_bf16_matmul",))
def filter_layer(x, complex_weight, ln_gamma, ln_beta, use_bf16_matmul=False):
    # use_bf16_matmul=True casts the DFT matmul operands to bf16 (f32 accumulate) for
    # extra MXU throughput on v5e/v6e/v7x; kept off by default so the f32 1e-4 check
    # against the jnp.fft reference holds.
    return _filter_layer_impl(x, complex_weight, ln_gamma, ln_beta, use_bf16_matmul)


def init_params(key, max_len, emb_dim):
    f = max_len // 2 + 1
    return {
        "complex_weight": jax.random.normal(key, (1, f, emb_dim, 2), jnp.float32) * 0.02,
        "ln_gamma": jnp.ones((emb_dim,), jnp.float32),
        "ln_beta": jnp.zeros((emb_dim,), jnp.float32),
    }


# ---------------------------------------------------------------------------
# Pure-JAX reference (jnp.fft) for a sanity check
# ---------------------------------------------------------------------------
def reference_forward(x, params):
    cw = params["complex_weight"]
    w = cw[..., 0] + 1j * cw[..., 1]                                  # (1, F, D)
    xf = jnp.fft.rfft(x, axis=1, norm="ortho") * w
    y = jnp.fft.irfft(xf, n=x.shape[1], axis=1, norm="ortho")
    h = y + x                                                         # dropout = identity (eval)
    u = jnp.mean(h, -1, keepdims=True)
    s = jnp.mean((h - u) ** 2, -1, keepdims=True)
    return params["ln_gamma"] * ((h - u) / jnp.sqrt(s + EPS)) + params["ln_beta"]


if __name__ == "__main__":
    B, S, D = 2, 8, 32            # batch, max_len (seq), emb_dim
    key = jax.random.PRNGKey(0)
    kp, kx = jax.random.split(key)
    params = init_params(kp, S, D)
    x = jax.random.normal(kx, (B, S, D), jnp.float32)

    out = filter_layer(x, params["complex_weight"], params["ln_gamma"], params["ln_beta"])
    out = jax.block_until_ready(out)

    ref = reference_forward(x, params)
    assert out.shape == (B, S, D)
    assert np.allclose(np.asarray(out), np.asarray(ref), rtol=1e-4, atol=1e-4)
    print("KERNEL_OK")
</pallas_src>

<mosaic_0001>
module attributes {stable_mosaic.version = 11 : i64} {
  func.func @_filter_kernel(%arg0: i32, %arg1: memref<8x128xf32, #tpu.memory_space<vmem>>, %arg2: memref<16x8xf32, #tpu.memory_space<vmem>>, %arg3: memref<2x8x8xf32, #tpu.memory_space<vmem>>, %arg4: memref<2x8x128xf32, #tpu.memory_space<vmem>>, %arg5: memref<2x128xf32, #tpu.memory_space<vmem>>, %arg6: memref<128x4xf32, #tpu.memory_space<vmem>>, %arg7: memref<4x128xf32, #tpu.memory_space<vmem>>, %arg8: memref<8x128xf32, #tpu.memory_space<vmem>>) attributes {dimension_semantics = [#tpu.dimension_semantics<parallel>], iteration_bounds = array<i64: 1>, scalar_prefetch = 0 : i64, scratch_operands = 0 : i64, tpu.core_type = #tpu.core_type<tc>, window_params = [{transform_indices = @transform_0, window_bounds = array<i64: 8, 128>}, {pipeline_mode = #tpu.pipeline_mode<synchronous>, transform_indices = @transform_1, window_bounds = array<i64: 16, 8>}, {pipeline_mode = #tpu.pipeline_mode<synchronous>, transform_indices = @transform_2, window_bounds = array<i64: 2, 8, 8>}, {pipeline_mode = #tpu.pipeline_mode<synchronous>, transform_indices = @transform_3, window_bounds = array<i64: 2, 8, 128>}, {pipeline_mode = #tpu.pipeline_mode<synchronous>, transform_indices = @transform_4, window_bounds = array<i64: 2, 128>}, {pipeline_mode = #tpu.pipeline_mode<synchronous>, transform_indices = @transform_5, window_bounds = array<i64: 128, 4>}, {pipeline_mode = #tpu.pipeline_mode<synchronous>, transform_indices = @transform_6, window_bounds = array<i64: 4, 128>}, {transform_indices = @transform_7, window_bounds = array<i64: 8, 128>}]} {
    %c0 = arith.constant 0 : index
    %c0_0 = arith.constant 0 : index
    %0 = vector.load %arg1[%c0, %c0_0] : memref<8x128xf32, #tpu.memory_space<vmem>>, vector<8x128xf32>
    %c0_1 = arith.constant 0 : index
    %c0_2 = arith.constant 0 : index
    %1 = vector.load %arg2[%c0_1, %c0_2] : memref<16x8xf32, #tpu.memory_space<vmem>>, vector<16x8xf32>
    %cst = arith.constant dense<0.000000e+00> : vector<16x128xf32>
    %2 = tpu.matmul %1, %0, %cst {dimension_numbers = #tpu.dot_dimension_numbers<[1], [0], [0], [1], [0, 0, 1, 1], [], []>} : vector<16x8xf32>, vector<8x128xf32>, vector<16x128xf32> -> vector<16x128xf32>
    %3 = vector.extract_strided_slice %2 {offsets = [0, 0], sizes = [8, 128], strides = [1, 1]} : vector<16x128xf32> to vector<8x128xf32>
    %4 = vector.extract_strided_slice %2 {offsets = [8, 0], sizes = [8, 128], strides = [1, 1]} : vector<16x128xf32> to vector<8x128xf32>
    %c0_3 = arith.constant 0 : index
    %c0_4 = arith.constant 0 : index
    %c0_5 = arith.constant 0 : index
    %5 = vector.load %arg4[%c0_3, %c0_4, %c0_5] : memref<2x8x128xf32, #tpu.memory_space<vmem>>, vector<1x8x128xf32>
    %6 = vector.shape_cast %5 : vector<1x8x128xf32> to vector<8x128xf32>
    %c1 = arith.constant 1 : index
    %c0_6 = arith.constant 0 : index
    %c0_7 = arith.constant 0 : index
    %7 = vector.load %arg4[%c1, %c0_6, %c0_7] : memref<2x8x128xf32, #tpu.memory_space<vmem>>, vector<1x8x128xf32>
    %8 = vector.shape_cast %7 : vector<1x8x128xf32> to vector<8x128xf32>
    %9 = arith.mulf %3, %6 : vector<8x128xf32>
    %10 = arith.mulf %4, %8 : vector<8x128xf32>
    %11 = arith.subf %9, %10 : vector<8x128xf32>
    %12 = arith.mulf %3, %8 : vector<8x128xf32>
    %13 = arith.mulf %4, %6 : vector<8x128xf32>
    %14 = arith.addf %12, %13 : vector<8x128xf32>
    %c0_8 = arith.constant 0 : index
    %c0_9 = arith.constant 0 : index
    %c0_10 = arith.constant 0 : index
    %15 = vector.load %arg3[%c0_8, %c0_9, %c0_10] : memref<2x8x8xf32, #tpu.memory_space<vmem>>, vector<1x8x8xf32>
    %16 = vector.shape_cast %15 : vector<1x8x8xf32> to vector<8x8xf32>
    %cst_11 = arith.constant dense<0.000000e+00> : vector<8x128xf32>
    %17 = tpu.matmul %16, %11, %cst_11 {dimension_numbers = #tpu.dot_dimension_numbers<[1], [0], [0], [1], [0, 0, 1, 1], [], []>} : vector<8x8xf32>, vector<8x128xf32>, vector<8x128xf32> -> vector<8x128xf32>
    %c1_12 = arith.constant 1 : index
    %c0_13 = arith.constant 0 : index
    %c0_14 = arith.constant 0 : index
    %18 = vector.load %arg3[%c1_12, %c0_13, %c0_14] : memref<2x8x8xf32, #tpu.memory_space<vmem>>, vector<1x8x8xf32>
    %19 = vector.shape_cast %18 : vector<1x8x8xf32> to vector<8x8xf32>
    %cst_15 = arith.constant dense<0.000000e+00> : vector<8x128xf32>
    %20 = tpu.matmul %19, %14, %cst_15 {dimension_numbers = #tpu.dot_dimension_numbers<[1], [0], [0], [1], [0, 0, 1, 1], [], []>} : vector<8x8xf32>, vector<8x128xf32>, vector<8x128xf32> -> vector<8x128xf32>
    %21 = arith.addf %17, %20 : vector<8x128xf32>
    %22 = arith.addf %21, %0 : vector<8x128xf32>
    %c0_16 = arith.constant 0 : index
    %c0_17 = arith.constant 0 : index
    %23 = vector.load %arg6[%c0_16, %c0_17] : memref<128x4xf32, #tpu.memory_space<vmem>>, vector<128x4xf32>
    %c0_18 = arith.constant 0 : index
    %c0_19 = arith.constant 0 : index
    %24 = vector.load %arg7[%c0_18, %c0_19] : memref<4x128xf32, #tpu.memory_space<vmem>>, vector<4x128xf32>
    %cst_20 = arith.constant dense<0.000000e+00> : vector<8x4xf32>
    %25 = tpu.matmul %22, %23, %cst_20 {dimension_numbers = #tpu.dot_dimension_numbers<[1], [0], [0], [1], [0, 0, 1, 1], [], []>} : vector<8x128xf32>, vector<128x4xf32>, vector<8x4xf32> -> vector<8x4xf32>
    %cst_21 = arith.constant dense<0.000000e+00> : vector<8x128xf32>
    %26 = tpu.matmul %25, %24, %cst_21 {dimension_numbers = #tpu.dot_dimension_numbers<[1], [0], [0], [1], [0, 0, 1, 1], [], []>} : vector<8x4xf32>, vector<4x128xf32>, vector<8x128xf32> -> vector<8x128xf32>
    %27 = arith.subf %22, %26 : vector<8x128xf32>
    %28 = arith.mulf %27, %27 : vector<8x128xf32>
    %cst_22 = arith.constant dense<0.000000e+00> : vector<8x4xf32>
    %29 = tpu.matmul %28, %23, %cst_22 {dimension_numbers = #tpu.dot_dimension_numbers<[1], [0], [0], [1], [0, 0, 1, 1], [], []>} : vector<8x128xf32>, vector<128x4xf32>, vector<8x4xf32> -> vector<8x4xf32>
    %cst_23 = arith.constant dense<0.000000e+00> : vector<8x128xf32>
    %30 = tpu.matmul %29, %24, %cst_23 {dimension_numbers = #tpu.dot_dimension_numbers<[1], [0], [0], [1], [0, 0, 1, 1], [], []>} : vector<8x4xf32>, vector<4x128xf32>, vector<8x128xf32> -> vector<8x128xf32>
    %c0_24 = arith.constant 0 : index
    %c0_25 = arith.constant 0 : index
    %31 = vector.load %arg5[%c0_24, %c0_25] : memref<2x128xf32, #tpu.memory_space<vmem>>, vector<2x128xf32>
    %32 = vector.extract_strided_slice %31 {offsets = [0, 0], sizes = [1, 128], strides = [1, 1]} : vector<2x128xf32> to vector<1x128xf32>
    %cst_26 = arith.constant 9.99999996E-13 : f32
    %33 = vector.broadcast %cst_26 : f32 to vector<8x128xf32>
    %34 = arith.addf %30, %33 : vector<8x128xf32>
    %35 = math.rsqrt %34 : vector<8x128xf32>
    %36 = arith.mulf %27, %35 : vector<8x128xf32>
    %37 = vector.broadcast %32 : vector<1x128xf32> to vector<8x128xf32>
    %38 = arith.mulf %37, %36 : vector<8x128xf32>
    %39 = vector.extract_strided_slice %31 {offsets = [1, 0], sizes = [1, 128], strides = [1, 1]} : vector<2x128xf32> to vector<1x128xf32>
    %40 = vector.broadcast %39 : vector<1x128xf32> to vector<8x128xf32>
    %41 = arith.addf %38, %40 : vector<8x128xf32>
    %c0_27 = arith.constant 0 : index
    %c0_28 = arith.constant 0 : index
    %42 = vector.load %arg8[%c0_27, %c0_28] : memref<8x128xf32, #tpu.memory_space<vmem>>, vector<8x128xf32>
    tpu.vector_store %arg8[%c0_27, %c0_28], %41 {strides = array<i32>} : memref<8x128xf32, #tpu.memory_space<vmem>>, vector<8x128xf32>,
    return
  }
  func.func @transform_0(%arg0: i32) -> (i32, i32) {
    %c0_i32 = arith.constant 0 : i32
    %c0_i32_0 = arith.constant 0 : i32
    return %c0_i32, %arg0 : i32, i32
  }
  func.func @transform_1(%arg0: i32) -> (i32, i32) {
    %c0_i32 = arith.constant 0 : i32
    %c0_i32_0 = arith.constant 0 : i32
    %c0_i32_1 = arith.constant 0 : i32
    return %c0_i32, %c0_i32_0 : i32, i32
  }
  func.func @transform_2(%arg0: i32) -> (i32, i32, i32) {
    %c0_i32 = arith.constant 0 : i32
    %c0_i32_0 = arith.constant 0 : i32
    %c0_i32_1 = arith.constant 0 : i32
    %c0_i32_2 = arith.constant 0 : i32
    return %c0_i32, %c0_i32_0, %c0_i32_1 : i32, i32, i32
  }
  func.func @transform_3(%arg0: i32) -> (i32, i32, i32) {
    %c0_i32 = arith.constant 0 : i32
    %c0_i32_0 = arith.constant 0 : i32
    %c0_i32_1 = arith.constant 0 : i32
    %c0_i32_2 = arith.constant 0 : i32
    return %c0_i32, %c0_i32_0, %c0_i32_1 : i32, i32, i32
  }
  func.func @transform_4(%arg0: i32) -> (i32, i32) {
    %c0_i32 = arith.constant 0 : i32
    %c0_i32_0 = arith.constant 0 : i32
    %c0_i32_1 = arith.constant 0 : i32
    return %c0_i32, %c0_i32_0 : i32, i32
  }
  func.func @transform_5(%arg0: i32) -> (i32, i32) {
    %c0_i32 = arith.constant 0 : i32
    %c0_i32_0 = arith.constant 0 : i32
    %c0_i32_1 = arith.constant 0 : i32
    return %c0_i32, %c0_i32_0 : i32, i32
  }
  func.func @transform_6(%arg0: i32) -> (i32, i32) {
    %c0_i32 = arith.constant 0 : i32
    %c0_i32_0 = arith.constant 0 : i32
    %c0_i32_1 = arith.constant 0 : i32
    return %c0_i32, %c0_i32_0 : i32, i32
  }
  func.func @transform_7(%arg0: i32) -> (i32, i32) {
    %c0_i32 = arith.constant 0 : i32
    %c0_i32_0 = arith.constant 0 : i32
    return %c0_i32, %arg0 : i32, i32
  }
}

</mosaic_0001>

<bundles_post_ra>
// kernel: tile.37
= control target key start
LH: loop header
LB: loop body
LE: loop exit
PB: predicated region body
PF: predicated region fallthrough
CT: control target
= control target key end

     0   :  { %s22_s0 = inlined_call_operand.vmem [shape: f32[32], index: 0, kind: input, shape index: {}]   ;;  %s23_s1 = inlined_call_operand.vmem [shape: f32[4,32], index: 1, kind: output, shape index: {}]  }
   0x1   :  { %v4_v0 = vld [vmem:[%s22_s0] ss:$0 sm:$0xff] }
   0x2   :  { %5 = vst [vmem:[%s23_s1] sm:$0xf] %v4_v0 }

// kernel: tile.39
= control target key start
LH: loop header
LB: loop body
LE: loop exit
PB: predicated region body
PF: predicated region fallthrough
CT: control target
= control target key end

     0   :  { %s37_s8 = smov 32   ;;  %s38_s9 = smov 64   ;;  %vm7_vm0 = vcmask 261120   ;;  %vm13_vm1 = vcmask 1048320   ;;  %vm19_vm2 = vcmask 785920   ;;  %vm25_vm3 = vcmask 523520   ;;  %s55_s0 = inlined_call_operand.vmem [shape: f32[4,32], index: 0, kind: input, shape index: {}]   ;;  %s56_s1 = inlined_call_operand.vmem [shape: f32[1,128], index: 1, kind: output, shape index: {}]  }
   0x1   :  { %v4_v0 = vld [vmem:[%s55_s0] sm:$0xf]  ;;  %s36_s0 = smov 96  }
   0x2   :  { %5 = vst [vmem:[#allocation1] sm:$0xf] %v4_v0 }
   0x9   :  { %v10_v1 = vld [vmem:[#allocation1 + $0x3] sm:$0x1]   ;;  %v22_v2 = vld [vmem:[#allocation1 + $0x1] sm:$0x1]   ;;  %v16_v3 = vld [vmem:[#allocation1 + $0x2] sm:$0x1]  }
   0xa   :  { %11 = vrot.lane.b32.xlu0 %v10_v1, %s36_s0  ;;  %23 = vrot.lane.b32.xlu1 %v22_v2, %s37_s8  ;;  %v6_v4 = vld [vmem:[#allocation1] sm:$0x1]  }
   0xb   :  { %8 = vst.msk [vmem:[#allocation0] sm:$0x1] %vm7_vm0, %v6_v4  }
  0x12   :  { %17 = vrot.lane.b32.xlu0 %v16_v3, %s38_s9 }
  0x7c   :  { %v12_v5 = vpop.permute.xlu0 %11   ;;  %v24_v6 = vpop.permute.xlu1 %23  }
  0x7d   :  { %14 = vst.msk [vmem:[#allocation0] sm:$0x1] %vm13_vm1, %v12_v5  }
  0x84   :  { %v18_v7 = vpop.permute.xlu0 %17  }
  0x85   :  { %20 = vst.msk [vmem:[#allocation0] sm:$0x1] %vm19_vm2, %v18_v7  }
  0x86   :  { %26 = vst.msk [vmem:[#allocation0] sm:$0x1] %vm25_vm3, %v24_v6  }
  0x8d   :  { %v29_v8 = vld [vmem:[#allocation0] sm:$0x1] }
  0x8e   :  { %32 = vst [vmem:[%s56_s1] sm:$0x1] %v29_v8 }

// kernel: filter_layer.1
= control target key start
LH: loop header
LB: loop body
LE: loop exit
PB: predicated region body
PF: predicated region fallthrough
CT: control target
= control target key end

     0   :  { %vm29_vm0 = vcmask 64512   ;;  %vm159_vm1 = vcmask 1043456   ;;  %vm155_vm2 = vcmask 31744   ;;  %s387_s0 = inlined_call_operand.vmem [shape: f32[8,128], index: 0, kind: input, shape index: {}]   ;;  %s388_s1 = inlined_call_operand.vmem [shape: f32[16,8], index: 1, kind: input, shape index: {}]   ;;  %s389_s5 = inlined_call_operand.vmem [shape: f32[128,4], index: 5, kind: input, shape index: {}]   ;;  %s390_s3 = inlined_call_operand.vmem [shape: f32[2,8,128], index: 3, kind: input, shape index: {}]   ;;  %s391_s2 = inlined_call_operand.vmem [shape: f32[2,8,8], index: 2, kind: input, shape index: {}]   ;;  %s392_s6 = inlined_call_operand.vmem [shape: f32[4,128], index: 6, kind: input, shape index: {}]   ;;  %s393_s4 = inlined_call_operand.vmem [shape: f32[2,128], index: 4, kind: input, shape index: {}]   ;;  %s394_s7 = inlined_call_operand.vmem [shape: f32[8,128], index: 7, kind: output, shape index: {}]  }
   0x1   :  { %v304_v0 = vld [vmem:[%s387_s0] sm:$0xff]  ;;  %v28_v2 = vld [vmem:[%s388_s1 + $0x8] sm:$0xff]  ;;  %v133_v3 = vld [vmem:[%s389_s5 + $0x78] sm:$0xff] }
   0x2   :  { %v27_v1 = vld [vmem:[%s388_s1] sm:$0xff]  ;;  %51 = vmatpush.msra.mxu1 %v304_v0  ;;  %v132_v4 = vld [vmem:[%s389_s5 + $0x70] sm:$0xff]  ;;  %135 = vmatpush.msra.mxu3 %v133_v3  ;;  %v131_v5 = vld [vmem:[%s389_s5 + $0x68] sm:$0xff] }
   0x3   :  { %249 = vmatmul.msk.f32.vlgmr.msra.gmra.mxu1 %vm29_vm0, %v27_v1  ;;  %185 = vmatpush.msra.mxu0 %v133_v3  ;;  %v130_v6 = vld [vmem:[%s389_s5 + $0x60] sm:$0xff]  ;;  %v129_v7 = vld [vmem:[%s389_s5 + $0x58] sm:$0xff]  ;;  %v128_v8 = vld [vmem:[%s389_s5 + $0x50] sm:$0xff] }
   0x4   :  { %136 = vmatpush.msra.mxu3 %v132_v4  ;;  %v127_v9 = vld [vmem:[%s389_s5 + $0x48] sm:$0xff]  ;;  %v126_v10 = vld [vmem:[%s389_s5 + $0x40] sm:$0xff]  ;;  %v125_v11 = vld [vmem:[%s389_s5 + $0x38] sm:$0xff] }
   0x5   :  { %186 = vmatpush.msra.mxu0 %v132_v4  ;;  %v124_v12 = vld [vmem:[%s389_s5 + $0x30] sm:$0xff]  ;;  %v123_v14 = vld [vmem:[%s389_s5 + $0x28] sm:$0xff]  ;;  %v122_v15 = vld [vmem:[%s389_s5 + $0x20] sm:$0xff] }
   0x6   :  { %137 = vmatpush.msra.mxu3 %v131_v5  ;;  %v121_v16 = vld [vmem:[%s389_s5 + $0x18] sm:$0xff]  ;;  %v59_v17 = vld [vmem:[%s390_s3] sm:$0xff]  ;;  %v251_v18 = vld [vmem:[%s390_s3 + $0x8] sm:$0xff] }
   0x7   :  { %187 = vmatpush.msra.mxu0 %v131_v5  ;;  %v68_v26 = vld [vmem:[%s391_s2] sm:$0xff]  ;;  %v252_v27 = vld [vmem:[%s391_s2 + $0x8] sm:$0xff]  ;;  %v120_v28 = vld [vmem:[%s389_s5 + $0x10] sm:$0xff] }
   0x8   :  { %138 = vmatpush.msra.mxu3 %v130_v6  ;;  %v119_v29 = vld [vmem:[%s389_s5 + $0x8] sm:$0xff]  ;;  %v118_v30 = vld [vmem:[%s389_s5] sm:$0xff] }
   0x9   :  { %188 = vmatpush.msra.mxu0 %v130_v6  ;;  %v134_v35 = vld [vmem:[%s392_s6] sm:$0xf] }
   0xa   :  { %139 = vmatpush.msra.mxu3 %v129_v7  ;;  %v205_v47 = vld [vmem:[%s393_s4] sm:$0x3] }
   0xb   :  { %250 = vmatmul.msk.f32.gmra.mxu1 %vm29_vm0, %v28_v2  ;;  %189 = vmatpush.msra.mxu0 %v129_v7  ;;  %v240_v50 = vperm.slane %v205_v47, 0  ;;  %v242_v53 = vperm.slane %v205_v47, 1 }
   0xc   :  { %140 = vmatpush.msra.mxu3 %v128_v8 }
   0xd   :  { %190 = vmatpush.msra.mxu0 %v128_v8 }
   0xe   :  { %141 = vmatpush.msra.mxu3 %v127_v9 }
   0xf   :  { %191 = vmatpush.msra.mxu0 %v127_v9 }
  0x10   :  { %142 = vmatpush.msra.mxu3 %v126_v10 }
  0x11   :  { %192 = vmatpush.msra.mxu0 %v126_v10 }
  0x12   :  { %143 = vmatpush.msra.mxu3 %v125_v11 }
  0x13   :  { %193 = vmatpush.msra.mxu0 %v125_v11 }
  0x14   :  { %144 = vmatpush.msra.mxu3 %v124_v12 }
  0x15   :  { %194 = vmatpush.msra.mxu0 %v124_v12 }
  0x16   :  { %145 = vmatpush.msra.mxu3 %v123_v14 }
  0x17   :  { %195 = vmatpush.msra.mxu0 %v123_v14 }
  0x18   :  { %146 = vmatpush.msra.mxu3 %v122_v15 }
  0x19   :  { %196 = vmatpush.msra.mxu0 %v122_v15 }
  0x1a   :  { %147 = vmatpush.msra.mxu3 %v121_v16 }
  0x1b   :  { %197 = vmatpush.msra.mxu0 %v121_v16 }
  0x1c   :  { %148 = vmatpush.msra.mxu3 %v120_v28 }
  0x1d   :  { %198 = vmatpush.msra.mxu0 %v120_v28 }
  0x1e   :  { %149 = vmatpush.msra.mxu3 %v119_v29 }
  0x1f   :  { %199 = vmatpush.msra.mxu0 %v119_v29 }
  0x20   :  { %150 = vmatpush.msra.mxu3 %v118_v30 }
  0x21   :  { %200 = vmatpush.msra.mxu0 %v118_v30 }
  0x80   :  { %v53_v13 = vpop.f32.mrf.mxu1 }
  0x81   :  { %v62_v20 = vmul.f32 %v59_v17, %v53_v13  ;;  %v65_v21 = vmul.f32 %v251_v18, %v53_v13 }
  0x88   :  { %v56_v19 = vpop.f32.mrf.mxu1 }
  0x89   :  { %v63_v22 = vmul.f32 %v251_v18, %v56_v19  ;;  %v66_v23 = vmul.f32 %v59_v17, %v56_v19 }
  0x8b   :  { %v67_v24 = vadd.f32 %v66_v23, %v65_v21  ;;  %v64_v25 = vsub.f32 %v62_v20, %v63_v22 }
  0x8d   :  { %89 = vmatpush.msrb.mxu1 %v67_v24  ;;  %112 = vmatpush.msra.mxu2 %v64_v25 }
  0x8e   :  { %254 = vmatmul.msk.f32.vlgmr.msra.gmra.mxu2 %vm29_vm0, %v68_v26  ;;  %253 = vmatmul.msk.f32.vlgmr.msrb.gmra.mxu1 %vm29_vm0, %v252_v27 }
  0x8f   :  { %255 = vmatpush.msk.msra.mxu1 %vm159_vm1, %v134_v35  ;;  %257 = vmatpush.msk.msrb.mxu2 %vm159_vm1, %v134_v35 }
 0x10b   :  { %v91_v31 = vpop.f32.mrf.mxu1 }
 0x111   :  { %v114_v32 = vpop.f32.mrf.mxu2 }
 0x112   :  { %v115_v33 = vadd.f32 %v114_v32, %v91_v31 }
 0x114   :  { %v117_v34 = vadd.f32 %v115_v33, %v304_v0 }
 0x116   :  { %151 = vmatmul.f32.vlgmr.msra.gmra.mxu3 %v117_v34 }
 0x199   :  { %v152_v36 = vpop.f32.mrf.mxu3 }
 0x19a   :  { %256 = vmatmul.msk.f32.vlgmr.msra.gmra.mxu1 %vm155_vm2, %v152_v36 }
 0x217   :  { %v180_v37 = vpop.f32.mrf.mxu1 }
 0x218   :  { %v183_v38 = vsub.f32 %v117_v34, %v180_v37 }
 0x21a   :  { %v184_v39 = vmul.f32 %v183_v38, %v183_v38 }
 0x21c   :  { %201 = vmatmul.f32.vlgmr.msra.gmra.mxu0 %v184_v39 }
 0x299   :  { %v202_v40 = vpop.f32.mrf.mxu0 }
 0x29a   :  { %258 = vmatmul.msk.f32.vlgmr.msrb.gmra.mxu2 %vm155_vm2, %v202_v40 }
 0x31d   :  { %v226_v41 = vpop.f32.mrf.mxu2 }
 0x31e   :  { %v227_v42 = vadd.f32 1e-12, %v226_v41 }
 0x320   :  { %259 = vrsqrt.f32 %v227_v42  ;;  %vm235_vm4 = vweird.f32 %v227_v42 }
 0x326   :  { %v260_v43 = vpop.eup %259 }
 0x327   :  { %v230_v44 = vmul.f32 %v260_v43, %v227_v42  ;;  %vm236_vm3 = vweird.f32 %v260_v43 }
 0x328   :  { %vm237_vm5 = vmor %vm235_vm4, %vm236_vm3 }
 0x329   :  { %v231_v45 = vmul.f32 %v260_v43, %v230_v44 }
 0x32b   :  { %v232_v46 = vmul.f32 0.5, %v231_v45 }
 0x32d   :  { %v233_v48 = vsub.f32 1.5, %v232_v46 }
 0x32f   :  { %v234_v49 = vmul.f32 %v260_v43, %v233_v48 }
 0x331   :  { %v238_v51 = vsel %vm237_vm5, %v260_v43, %v234_v49 }
 0x332   :  { %v239_v52 = vmul.f32 %v238_v51, %v183_v38 }
 0x334   :  { %v241_v54 = vmul.f32 %v240_v50, %v239_v52 }
 0x336   :  { %v243_v55 = vadd.f32 %v242_v53, %v241_v54 }
 0x338   :  { %244 = vst [vmem:[%s394_s7] sm:$0xff] %v243_v55 }

</bundles_post_ra>
